<compile_context>
chip_gen: v7x
topology: tpu7x:2x2x1
jax: 0.10.0
libtpu: 0.0.40
codegen_flags: <defaults>
</compile_context>

<pallas_src>
import jax
import jax.numpy as jnp
from jax import lax
from jax.experimental import pallas as pl
from jax.experimental.pallas import tpu as pltpu


def self_attention_kernel(gamma_ref,        # SMEM (1,)
                          xq_ref,           # VMEM (1, C, TQ)  query-token slice of x
                          xf_ref,           # VMEM (1, C, N)   full x (keys / values)
                          m_ref,            # VMEM (C, C) bf16  Wq^T @ Wk
                          c_ref,            # VMEM (1, C) bf16  bq @ Wk
                          wv_ref,           # VMEM (C, C) bf16  value weight
                          bv_ref,           # VMEM (C, 1) f32   value bias
                          o_ref):           # VMEM (1, C, TQ)
    x_q = xq_ref[0]                          # (C, TQ) f32
    x_f = xf_ref[0]                          # (C, N)  f32
    xq_b = x_q.astype(jnp.bfloat16)
    xf_b = x_f.astype(jnp.bfloat16)

    # Folded score core: energy[i, j] = x_i^T (Wq^T Wk) x_j + (bq @ Wk) . x_j
    # (terms constant along j are dropped; softmax over j is invariant to them)
    mk = jnp.dot(m_ref[...], xf_b, preferred_element_type=jnp.float32)        # (C, N)
    energy = lax.dot_general(
        xq_b, mk.astype(jnp.bfloat16),
        dimension_numbers=(((0,), (0,)), ((), ())),                           # contract over C
        preferred_element_type=jnp.float32)                                   # (TQ, N)
    energy = energy + jnp.dot(c_ref[...], xf_b,
                              preferred_element_type=jnp.float32)             # (1, N) bcast

    # Value projection (1x1 conv == channel matmul) in (C, N) layout.
    v = jnp.dot(wv_ref[...], xf_b,
                preferred_element_type=jnp.float32) + bv_ref[...]             # (C, N)

    # Numerically stable softmax over keys; reciprocal goes to the EUP slot.
    m_row = jnp.max(energy, axis=-1, keepdims=True)                           # (TQ, 1)
    p = jnp.exp(energy - m_row)                                               # (TQ, N)
    inv = pl.reciprocal(jnp.sum(p, axis=-1, keepdims=True), approx=True)      # (TQ, 1)
    att = (p * inv).astype(jnp.bfloat16)                                      # (TQ, N)

    # out[c, i] = sum_j v[c, j] * att[i, j]   (contract over tokens N)
    out = lax.dot_general(
        v.astype(jnp.bfloat16), att,
        dimension_numbers=(((1,), (1,)), ((), ())),
        preferred_element_type=jnp.float32)                                   # (C, TQ)

    gamma = gamma_ref[0]
    o_ref[0] = (gamma * out + x_q).astype(o_ref.dtype)


def self_attention_pallas(x_nchw, params):
    """x_nchw: (B, C, H, W) float32.  Returns (B, C, H, W)."""
    B, C, H, W = x_nchw.shape
    N = H * W

    # No transpose: (B, C, H, W) -> (B, C, N) is a free reshape.
    x_bcn = x_nchw.reshape(B, C, N)

    # Query-row tiling keeps the live score tile at (TQ, N) instead of (N, N).
    TQ = 128 if N % 128 == 0 else N
    n_q = N // TQ

    wq, bq = params["wq"], params["bq"]      # (Cq, C), (Cq,)
    wk, bk = params["wk"], params["bk"]      # (Cq, C), (Cq,)   (bk cancels in softmax)
    wv, bv = params["wv"], params["bv"]      # (C, C),  (C,)
    gamma = params["gamma"]                  # (1,)
    del bk  # row-constant contribution; softmax-invariant

    # Host-side folding (f32), then bf16 for the MXU.
    m_fused = jnp.dot(wq.T, wk).astype(jnp.bfloat16)               # (C, C)
    c_fused = jnp.dot(bq, wk).reshape(1, C).astype(jnp.bfloat16)   # (1, C)
    wv_b = wv.astype(jnp.bfloat16)                                  # (C, C)
    bv_col = bv.reshape(C, 1).astype(jnp.float32)                   # (C, 1)

    full = lambda shape: pl.BlockSpec(shape, lambda b, qi: (0,) * len(shape))

    out_bcn = pl.pallas_call(
        self_attention_kernel,
        out_shape=jax.ShapeDtypeStruct((B, C, N), x_nchw.dtype),
        grid_spec=pltpu.PrefetchScalarGridSpec(
            num_scalar_prefetch=0,
            grid=(B, n_q),
            in_specs=[
                pl.BlockSpec(memory_space=pltpu.MemorySpace.SMEM),    # gamma
                pl.BlockSpec((1, C, TQ), lambda b, qi: (b, 0, qi)),   # x query tile
                pl.BlockSpec((1, C, N), lambda b, qi: (b, 0, 0)),     # x full (K/V source)
                full((C, C)),                                         # fused Wq^T Wk
                full((1, C)),                                         # bq @ Wk
                full((C, C)),                                         # value weight
                full((C, 1)),                                         # value bias
            ],
            out_specs=pl.BlockSpec((1, C, TQ), lambda b, qi: (b, 0, qi)),
        ),
        compiler_params=pltpu.CompilerParams(
            dimension_semantics=("parallel", "parallel")),
    )(gamma, x_bcn, x_bcn, m_fused, c_fused, wv_b, bv_col)

    return out_bcn.reshape(B, C, H, W)


def make_params(key, C):
    """Deterministic synthetic parameters matching the module's __init__ shapes."""
    Cq = C // 8
    kq, kk, kv, kbq, kbk, kbv = jax.random.split(key, 6)

    def sn_weight(k, cout, cin):
        # Conv2d weight (cout, cin, 1, 1) -> matrix (cout, cin); divide by the
        # largest singular value (spectral_norm forward semantics).
        w = jax.random.normal(k, (cout, cin), jnp.float32) * 0.2
        sigma = jnp.linalg.svd(w, compute_uv=False)[0]
        return w / sigma

    return {
        "wq": sn_weight(kq, Cq, C),
        "bq": (jax.random.normal(kbq, (Cq,)) * 0.05).astype(jnp.float32),
        "wk": sn_weight(kk, Cq, C),
        "bk": (jax.random.normal(kbk, (Cq,)) * 0.05).astype(jnp.float32),
        "wv": sn_weight(kv, C, C),
        "bv": (jax.random.normal(kbv, (C,)) * 0.05).astype(jnp.float32),
        "gamma": jnp.zeros((1,), jnp.float32),   # nn.Parameter(torch.zeros(1))
    }


def self_attention_reference(x_nchw, params):
    """Pure-JAX reference mirroring the PyTorch forward exactly (unfolded weights)."""
    B, C, H, W = x_nchw.shape
    N = H * W
    x = x_nchw.reshape(B, C, N)                                    # (B, C, N)
    q = jnp.einsum("oc,bcn->bon", params["wq"], x) + params["bq"].reshape(1, -1, 1)
    k = jnp.einsum("oc,bcn->bon", params["wk"], x) + params["bk"].reshape(1, -1, 1)
    v = jnp.einsum("oc,bcn->bon", params["wv"], x) + params["bv"].reshape(1, -1, 1)
    energy = jnp.einsum("bci,bcj->bij", q, k)                      # (B, N, N)
    att = jax.nn.softmax(energy, axis=-1)
    out = jnp.einsum("bcj,bij->bci", v, att)                       # (B, C, N)
    out = params["gamma"][0] * out + x
    return out.reshape(B, C, H, W)


if __name__ == "__main__":
    B, C, H, W = 2, 32, 16, 16   # N = 256, Cq = 4, TQ = 128
    key = jax.random.PRNGKey(0)
    kx, kp = jax.random.split(key)

    x = jax.random.normal(kx, (B, C, H, W), jnp.float32)
    params = make_params(kp, C)

    out = jax.block_until_ready(self_attention_pallas(x, params))
    ref = self_attention_reference(x, params)
    assert out.shape == (B, C, H, W)
    # gamma == 0: attention branch is zeroed, residual path must match tightly.
    assert jnp.allclose(out, ref, atol=1e-5, rtol=1e-5), "mismatch vs JAX reference (gamma=0)"

    # Exercise the attention path with a nonzero gamma (bf16 MXU + folded
    # Wq^T Wk + approx reciprocal -> loosened tolerance).
    params_g = dict(params, gamma=jnp.array([0.5], jnp.float32))
    out_g = jax.block_until_ready(self_attention_pallas(x, params_g))
    ref_g = self_attention_reference(x, params_g)
    max_err = jnp.max(jnp.abs(out_g - ref_g))
    assert jnp.allclose(out_g, ref_g, atol=3e-2, rtol=3e-2), (
        f"mismatch (gamma!=0), max|err|={max_err}")

    print("KERNEL_OK")
</pallas_src>

<mosaic_0001>
module attributes {stable_mosaic.version = 11 : i64} {
  func.func @self_attention_kernel(%arg0: i32, %arg1: i32, %arg2: memref<1xf32, #tpu.memory_space<smem>>, %arg3: memref<1x32x128xf32, #tpu.memory_space<vmem>>, %arg4: memref<1x32x256xf32, #tpu.memory_space<vmem>>, %arg5: memref<32x32xbf16, #tpu.memory_space<vmem>>, %arg6: memref<1x32xbf16, #tpu.memory_space<vmem>>, %arg7: memref<32x32xbf16, #tpu.memory_space<vmem>>, %arg8: memref<32x1xf32, #tpu.memory_space<vmem>>, %arg9: memref<1x32x128xf32, #tpu.memory_space<vmem>>) attributes {dimension_semantics = [#tpu.dimension_semantics<parallel>, #tpu.dimension_semantics<parallel>], iteration_bounds = array<i64: 2, 2>, scalar_prefetch = 0 : i64, scratch_operands = 0 : i64, tpu.core_type = #tpu.core_type<tc>, window_params = [{transform_indices = @transform_0, window_bounds = array<i64: 1>}, {transform_indices = @transform_1, window_bounds = array<i64: 1, 32, 128>}, {transform_indices = @transform_2, window_bounds = array<i64: 1, 32, 256>}, {pipeline_mode = #tpu.pipeline_mode<synchronous>, transform_indices = @transform_3, window_bounds = array<i64: 32, 32>}, {pipeline_mode = #tpu.pipeline_mode<synchronous>, transform_indices = @transform_4, window_bounds = array<i64: 1, 32>}, {pipeline_mode = #tpu.pipeline_mode<synchronous>, transform_indices = @transform_5, window_bounds = array<i64: 32, 32>}, {pipeline_mode = #tpu.pipeline_mode<synchronous>, transform_indices = @transform_6, window_bounds = array<i64: 32, 1>}, {transform_indices = @transform_7, window_bounds = array<i64: 1, 32, 128>}]} {
    %c0 = arith.constant 0 : index
    %c0_0 = arith.constant 0 : index
    %c0_1 = arith.constant 0 : index
    %0 = vector.load %arg3[%c0, %c0_0, %c0_1] : memref<1x32x128xf32, #tpu.memory_space<vmem>>, vector<1x32x128xf32>
    %1 = vector.shape_cast %0 : vector<1x32x128xf32> to vector<32x128xf32>
    %c0_2 = arith.constant 0 : index
    %c0_3 = arith.constant 0 : index
    %c0_4 = arith.constant 0 : index
    %2 = vector.load %arg4[%c0_2, %c0_3, %c0_4] : memref<1x32x256xf32, #tpu.memory_space<vmem>>, vector<1x32x256xf32>
    %3 = vector.shape_cast %2 : vector<1x32x256xf32> to vector<32x256xf32>
    %4 = arith.truncf %1 : vector<32x128xf32> to vector<32x128xbf16>
    %5 = arith.truncf %3 : vector<32x256xf32> to vector<32x256xbf16>
    %c0_5 = arith.constant 0 : index
    %c0_6 = arith.constant 0 : index
    %6 = vector.load %arg5[%c0_5, %c0_6] : memref<32x32xbf16, #tpu.memory_space<vmem>>, vector<32x32xbf16>
    %cst = arith.constant dense<0.000000e+00> : vector<32x256xf32>
    %7 = tpu.matmul %6, %5, %cst {dimension_numbers = #tpu.dot_dimension_numbers<[1], [0], [0], [1], [0, 0, 1, 1], [], []>} : vector<32x32xbf16>, vector<32x256xbf16>, vector<32x256xf32> -> vector<32x256xf32>
    %8 = arith.truncf %7 : vector<32x256xf32> to vector<32x256xbf16>
    %cst_7 = arith.constant dense<0.000000e+00> : vector<128x256xf32>
    %9 = tpu.matmul %4, %8, %cst_7 {dimension_numbers = #tpu.dot_dimension_numbers<[0], [0], [1], [1], [0, 1, 1, 1], [], []>} : vector<32x128xbf16>, vector<32x256xbf16>, vector<128x256xf32> -> vector<128x256xf32>
    %c0_8 = arith.constant 0 : index
    %c0_9 = arith.constant 0 : index
    %10 = vector.load %arg6[%c0_8, %c0_9] : memref<1x32xbf16, #tpu.memory_space<vmem>>, vector<1x32xbf16>
    %cst_10 = arith.constant dense<0.000000e+00> : vector<1x256xf32>
    %11 = tpu.matmul %10, %5, %cst_10 {dimension_numbers = #tpu.dot_dimension_numbers<[1], [0], [0], [1], [0, 0, 1, 1], [], []>} : vector<1x32xbf16>, vector<32x256xbf16>, vector<1x256xf32> -> vector<1x256xf32>
    %12 = vector.broadcast %11 : vector<1x256xf32> to vector<128x256xf32>
    %13 = arith.addf %9, %12 : vector<128x256xf32>
    %c0_11 = arith.constant 0 : index
    %c0_12 = arith.constant 0 : index
    %14 = vector.load %arg7[%c0_11, %c0_12] : memref<32x32xbf16, #tpu.memory_space<vmem>>, vector<32x32xbf16>
    %cst_13 = arith.constant dense<0.000000e+00> : vector<32x256xf32>
    %15 = tpu.matmul %14, %5, %cst_13 {dimension_numbers = #tpu.dot_dimension_numbers<[1], [0], [0], [1], [0, 0, 1, 1], [], []>} : vector<32x32xbf16>, vector<32x256xbf16>, vector<32x256xf32> -> vector<32x256xf32>
    %c0_14 = arith.constant 0 : index
    %c0_15 = arith.constant 0 : index
    %16 = vector.load %arg8[%c0_14, %c0_15] : memref<32x1xf32, #tpu.memory_space<vmem>>, vector<32x1xf32>
    %17 = vector.broadcast %16 : vector<32x1xf32> to vector<32x256xf32>
    %18 = arith.addf %15, %17 : vector<32x256xf32>
    %cst_16 = arith.constant dense<0xFF800000> : vector<128xf32>
    %19 = vector.multi_reduction <maximumf>, %13, %cst_16 [1] : vector<128x256xf32> to vector<128xf32>
    %20 = vector.shape_cast %19 : vector<128xf32> to vector<128x1xf32>
    %21 = vector.broadcast %20 : vector<128x1xf32> to vector<128x256xf32>
    %22 = arith.subf %13, %21 : vector<128x256xf32>
    %23 = math.exp %22 : vector<128x256xf32>
    %cst_17 = arith.constant dense<0.000000e+00> : vector<128xf32>
    %24 = vector.multi_reduction <add>, %23, %cst_17 [1] : vector<128x256xf32> to vector<128xf32>
    %25 = vector.shape_cast %24 : vector<128xf32> to vector<128x1xf32>
    %26 = tpu.reciprocal %25 {approx = true} : vector<128x1xf32> -> vector<128x1xf32>
    %27 = vector.broadcast %26 : vector<128x1xf32> to vector<128x256xf32>
    %28 = arith.mulf %23, %27 : vector<128x256xf32>
    %29 = arith.truncf %28 : vector<128x256xf32> to vector<128x256xbf16>
    %30 = arith.truncf %18 : vector<32x256xf32> to vector<32x256xbf16>
    %cst_18 = arith.constant dense<0.000000e+00> : vector<32x128xf32>
    %31 = tpu.matmul %30, %29, %cst_18 {dimension_numbers = #tpu.dot_dimension_numbers<[1], [1], [0], [0], [0, 0, 1, 0], [], []>} : vector<32x256xbf16>, vector<128x256xbf16>, vector<32x128xf32> -> vector<32x128xf32>
    %c0_19 = arith.constant 0 : index
    %32 = memref.load %arg2[%c0_19] : memref<1xf32, #tpu.memory_space<smem>>
    %33 = vector.broadcast %32 : f32 to vector<32x128xf32>
    %34 = arith.mulf %33, %31 : vector<32x128xf32>
    %35 = arith.addf %34, %1 : vector<32x128xf32>
    %c0_20 = arith.constant 0 : index
    %c0_21 = arith.constant 0 : index
    %c0_22 = arith.constant 0 : index
    %36 = vector.load %arg9[%c0_20, %c0_21, %c0_22] : memref<1x32x128xf32, #tpu.memory_space<vmem>>, vector<1x32x128xf32>
    %37 = vector.shape_cast %36 : vector<1x32x128xf32> to vector<32x128xf32>
    %38 = vector.shape_cast %35 : vector<32x128xf32> to vector<1x32x128xf32>
    tpu.vector_store %arg9[%c0_20, %c0_21, %c0_22], %38 {strides = array<i32>} : memref<1x32x128xf32, #tpu.memory_space<vmem>>, vector<1x32x128xf32>,
    return
  }
  func.func @transform_0(%arg0: i32, %arg1: i32) -> i32 {
    %c0_i32 = arith.constant 0 : i32
    %c0_i32_0 = arith.constant 0 : i32
    return %c0_i32 : i32
  }
  func.func @transform_1(%arg0: i32, %arg1: i32) -> (i32, i32, i32) {
    %c0_i32 = arith.constant 0 : i32
    %c0_i32_0 = arith.constant 0 : i32
    return %arg0, %c0_i32, %arg1 : i32, i32, i32
  }
  func.func @transform_2(%arg0: i32, %arg1: i32) -> (i32, i32, i32) {
    %c0_i32 = arith.constant 0 : i32
    %c0_i32_0 = arith.constant 0 : i32
    %c0_i32_1 = arith.constant 0 : i32
    return %arg0, %c0_i32, %c0_i32_0 : i32, i32, i32
  }
  func.func @transform_3(%arg0: i32, %arg1: i32) -> (i32, i32) {
    %c0_i32 = arith.constant 0 : i32
    %c0_i32_0 = arith.constant 0 : i32
    %c0_i32_1 = arith.constant 0 : i32
    return %c0_i32, %c0_i32_0 : i32, i32
  }
  func.func @transform_4(%arg0: i32, %arg1: i32) -> (i32, i32) {
    %c0_i32 = arith.constant 0 : i32
    %c0_i32_0 = arith.constant 0 : i32
    %c0_i32_1 = arith.constant 0 : i32
    return %c0_i32, %c0_i32_0 : i32, i32
  }
  func.func @transform_5(%arg0: i32, %arg1: i32) -> (i32, i32) {
    %c0_i32 = arith.constant 0 : i32
    %c0_i32_0 = arith.constant 0 : i32
    %c0_i32_1 = arith.constant 0 : i32
    return %c0_i32, %c0_i32_0 : i32, i32
  }
  func.func @transform_6(%arg0: i32, %arg1: i32) -> (i32, i32) {
    %c0_i32 = arith.constant 0 : i32
    %c0_i32_0 = arith.constant 0 : i32
    %c0_i32_1 = arith.constant 0 : i32
    return %c0_i32, %c0_i32_0 : i32, i32
  }
  func.func @transform_7(%arg0: i32, %arg1: i32) -> (i32, i32, i32) {
    %c0_i32 = arith.constant 0 : i32
    %c0_i32_0 = arith.constant 0 : i32
    return %arg0, %c0_i32, %arg1 : i32, i32, i32
  }
}

</mosaic_0001>

<bundles_post_ra>
// kernel: tpu_custom_call.1
= control target key start
LH: loop header
LB: loop body
LE: loop exit
PB: predicated region body
PF: predicated region fallthrough
CT: control target
= control target key end

     0   :  { %s2401_s0 = inlined_call_operand.<no memory space> [shape: f32[1], index: 0, kind: input, shape index: {}]   ;;  %s2402_s1 = inlined_call_operand.hbm [shape: f32[2,32,256], index: 1, kind: input, shape index: {}]   ;;  %s2403_s2 = inlined_call_operand.hbm [shape: f32[2,32,256], index: 2, kind: input, shape index: {}]   ;;  %s2404_s3 = inlined_call_operand.vmem [shape: bf16[32,32], index: 3, kind: input, shape index: {}]   ;;  %s2405_s4 = inlined_call_operand.vmem [shape: bf16[1,32], index: 4, kind: input, shape index: {}]   ;;  %s2406_s5 = inlined_call_operand.vmem [shape: bf16[32,32], index: 5, kind: input, shape index: {}]   ;;  %s2407_s6 = inlined_call_operand.vmem [shape: f32[32,1], index: 6, kind: input, shape index: {}]   ;;  %s2408_s7 = inlined_call_operand.hbm [shape: f32[2,32,256], index: 7, kind: output, shape index: {}]  }
   0x1   :  { %2422 = sst [smem:[#allocation18_spill]] %s2408_s7 }
   0x2   :  { %12 = sst [smem:[#allocation2]] %s2401_s0 }
   0x3   :  { %13 = vsyncpa [#allocation4], 0 }
   0x4   :  { %15 = vsyncpa [#allocation4 + $0x1], 0 }
   0x5   :  { %16 = vsyncpa [#allocation7], 0 }
   0x6   :  { %18 = vsyncpa [#allocation7 + $0x1], 0 }
   0x7   :  { %19 = vsyncpa [#allocation5], 0 }
   0x8   :  { %21 = vsyncpa [#allocation5 + $0x1], 0  ;;  %s1704_s26 = smov 0   ;;  %s1706_s27 = smov 0  }
   0x9   :  { %s1708_s28 = smov 0   ;;  %s1710_s29 = smov 0  }
   0xa   :  { %s1712_s30 = smov 0   ;;  %s1714_s8 = smov 0  }
   0xb   :  { %s1716_s9 = smov 0   ;;  %s1718_s0 = smov 0  }
   0xc   :  { %s1720_s10 = smov 0   ;;  %s1722_s11 = smov 0  }
   0xd   :  { %s1724_s12 = smov 0  }
   0xe LB: > { %2423 = sst [smem:[#allocation12_spill]] %s1632_s9  ;;  %s2409_s13 = sadd.s32 4294967295, %s1648_s12   ;;  %s1648_s12 = sphi %s1724_s12, %s27_s12   ;;  %s1644_s11 = sphi %s1722_s11, %s2463_s11   ;;  %s1640_s10 = sphi %s1720_s10, %s2462_s10   ;;  %s1636_s0 = sphi %s1718_s0, %s2461_s0   ;;  %s1632_s9 = sphi %s1716_s9, %s2460_s9   ;;  %s1628_s8 = sphi %s1714_s8, %s2459_s8   ;;  %s1624_s30 = sphi %s1712_s30, %s2458_s30   ;;  %s1620_s29 = sphi %s1710_s29, %s2457_s29   ;;  %s1616_s28 = sphi %s1708_s28, %s2456_s28   ;;  %s1612_s27 = sphi %s1706_s27, %s2455_s27   ;;  %s1608_s26 = sphi %s1704_s26, %s2454_s26  }
   0xf   : > { %2424 = sst [smem:[#allocation13_spill]] %s1636_s0  ;;  %s1205_s14 = sadd.s32 4294967294, %s1648_s12  }
  0x10   : > { %s36_s15 = sadd.s32 1, %s1640_s10  ;;  %s39_s16 = sadd.s32 1, %s1644_s11 }
  0x11   : > { %p37_p0 = scmp.ge.s32.totalorder %s36_s15, 2  ;;  %s69_s17 = sadd.s32 1, %s1628_s8 }
  0x12   : > { %p76_p1 = scmp.ne.s32.totalorder %s1628_s8, %s1624_s30  ;;  %p2417_p2 = scmp.eq.s32.totalorder %s1648_s12, 0 }
  0x13   : > { %s2465_s15 = smov (%p37_p0, %s36_s15), 0  ;;  %s2467_s16 = smov (!%p37_p0, %s39_s16), %s1644_s11 }
  0x14   : > { %2425 = sst [smem:[#allocation14_spill]] %s2465_s15  ;;  %s65_s18 = ssub.s32 %s1640_s10, %s2465_s15 }
  0x15   : > { %p1774_p3 = por %p2417_p2, %p76_p1  ;;  %p41_p4 = scmp.ge.s32.totalorder %s2467_s16, 2 }
  0x16   : > { %p2418_p5 = scmp.ne.s32.totalorder %s1624_s30, %s1620_s29  ;;  %p218_p6 = scmp.eq.s32.totalorder %s2409_s13, 3 }
  0x17   : > { %p224_p7 = scmp.eq.s32.totalorder %s1205_s14, 3  ;;  %s2469_s16 = smov (%p41_p4, %s2467_s16), 0 }
  0x18   : > { %2427 = sst [smem:[#allocation15_spill]] %s2469_s16  ;;  %p1784_p8 = por %p218_p6, %p76_p1 }
  0x19   : > { %p1791_p9 = por %p224_p7, %p2418_p5  ;;  %s1797_s22 = ssub.s32 %s1644_s11, %s2469_s16 }
  0x1a   : > { %s2428_s20 = scalar_select %p1784_p8, 1, 0 }
  0x1b   : > { %s2430_s21 = scalar_select %p1791_p9, 1, 0 }
  0x1c   : > { %2429 = sst [smem:[#allocation16_spill]] %s2428_s20  ;;  %s66_s23 = sor.u32 %s65_s18, %s1797_s22 }
  0x1d   : > { %2431 = sst [smem:[#allocation17_spill]] %s2430_s21  ;;  %p67_p11 = scmp.eq.s32.totalorder %s66_s23, 0 }
  0x1e   : > { %p2416_p12 = scmp.lt.s32.totalorder %s1648_s12, 4  ;;  %s259_s24 = sand.u32 1, %s1628_s8  }
  0x1f   : > { %s1209_s25 = sshll.u32 %s1644_s11, 3  ;;  %s1208_s13 = sshll.u32 %s259_s24, 5 }
  0x20   : > { %s1805_s14 = scalar_select %p67_p11, %s1628_s8, %s69_s17  }
  0x21   : > { %s268_s15 = sadd.s32 %s1640_s10, %s1209_s25  ;;  %s263_s20 = scalar_lea.vmem [#allocation3], %s1208_s13 }
  0x22   : > { %s1210_s7 = sshll.u32 %s268_s15, 7  ;;  %s271_s21 = sshll.u32 %s263_s20, 4  ;;  %s1813_s21 = int_to_ptr.vmem [resolvable:$true] %s271_s21 }
  0x23   : > { %s1811_s16 = scalar_lea.hbm %s2402_s1, %s1210_s7  ;;  %p1819_p13 = pnand %p2416_p12, %p1774_p3 }
  0x24   : > { %s1824_s13 = scalar_lea.sflag [#allocation4], %s259_s24  ;;  %s1462_s9 = scalar_lea.hbm %s1811_s16, 512 }
  0x25   : > { %p1463_p1 = scmp.ne.s32.totalorder %s1811_s16, %s1462_s9  ;;  %p1464_p4 = pneg %p1819_p13 }
  0x26   : > { %s1467_s15 = scalar_lea.hbm %s2402_s1, 2048  ;;  %p1468_p3 = scmp.lt.u32.totalorder %s1811_s16, %s2402_s1 }
  0x27   : > { %p1465_p6 = pnand %p1464_p4, %p1463_p1  ;;  %p1469_p11 = scmp.lt.u32.totalorder %s1467_s15, %s1462_s9 }
  0x28   : > { %p1471_p2 = scmp.lt.u32.totalorder %s1462_s9, %s1811_s16 }
  0x29   : > { %p1466_p7 = pneg %p1465_p6  ;;  %p1470_p12 = por %p1469_p11, %p1468_p3 }
  0x2b   : > { %p1472_p5 = por %p1471_p2, %p1470_p12 }
  0x2d   : > { %p1473_p10 = pnand %p1472_p5, %p1466_p7 }
  0x2f   : > { %1476 = shalt.err (!%p1473_p10)
}
  0x30   : > { %s1477_s20 = scalar_lea.vmem %s1813_s21, 512  ;;  %s1650_s23 = smov [#allocation3]  }
  0x31   : > { %p1478_p1 = scmp.ne.s32.totalorder %s1813_s21, %s1477_s20  ;;  %s1482_s24 = sshll.u32 %s1650_s23, 4  ;;  %s1483_s24 = int_to_ptr.vmem [resolvable:$false] %s1482_s24 }
  0x32   : > { %s1484_s25 = scalar_lea.vmem %s1483_s24, 1024  ;;  %p1485_p9 = scmp.lt.s32.totalorder %s1813_s21, %s1483_s24 }
  0x33   : > { %p1480_p6 = pnand %p1478_p1, %p1464_p4  ;;  %p1486_p3 = scmp.lt.s32.totalorder %s1484_s25, %s1477_s20 }
  0x35   : > { %p1481_p0 = pneg %p1480_p6  ;;  %p1487_p11 = por %p1486_p3, %p1485_p9 }
  0x37   : > { %p1488_p2 = pnand %p1487_p11, %p1481_p0 }
  0x39   : > { %1491 = shalt.err (!%p1488_p2)
}
  0x3a   : > { %s1651_s9 = smov 256   ;;  %s1652_s7 = smov 128  }
  0x3b   : > { %s1653_s0 = smov 8   ;;  %p300_p5 = scmp.lt.s32.totalorder %s1648_s12, 5 }
  0x3c   : > { %1250 = dma.hbm_to_vmem [thread:$0]  (!%p1819_p13), %s1811_s16, 512, %s1813_s21, %s1824_s13, %s1651_s9, %s1652_s7, %s1653_s0  }
  0x3d   : > { %p2433_p9 = scmp.ge.s32.totalorder %s1648_s12, 1  ;;  %s2435_s18 = sadd.s32 4294967295, %s1648_s12  }
  0x3e   : > { %p83_p12 = scmp.eq.s32.totalorder %s2435_s18, 0  ;;  %s95_s19 = sadd.s32 1, %s1616_s28 }
  0x3f   : > { %p1856_p10 = pnand %p2433_p9, %p300_p5  ;;  %p2436_p0 = scmp.eq.s32.totalorder %s1797_s22, 0 }
  0x40   : > { %p2437_p4 = scmp.ne.s32.totalorder %s1624_s30, %s1620_s29  ;;  %p102_p1 = scmp.ne.s32.totalorder %s1616_s28, %s1612_s27 }
  0x41   : > { %s1866_s20 = scalar_select %p2436_p0, %s1616_s28, %s95_s19  }
  0x42   : > { %p1871_p7 = por %p83_p12, %p2437_p4  ;;  %p108_p13 = scmp.ne.s32.totalorder %s1612_s27, %s1608_s26 }
  0x43   : > { %s281_s16 = sand.u32 1, %s1616_s28   ;;  %p2439_p6 = scmp.eq.s32.totalorder %s1648_s12, 0 }
  0x44   : > { %s2438_s23 = scalar_select %p1871_p7, 1, 0 }
  0x45   : > { %p104_p3 = por %p102_p1, %p2439_p6  ;;  %p1882_p11 = por %p108_p13, %p83_p12 }
  0x46   : > { %s1211_s17 = sshll.u32 %s281_s16, 6  ;;  %s1240_s13 = sshll.u32 %s1644_s11, 10 }
  0x47   : > { %s2440_s21 = scalar_select %p1882_p11, 1, 0 }
  0x48   : > { %s1890_s25 = scalar_lea.hbm %s2403_s2, %s1240_s13  ;;  %s285_s7 = scalar_lea.vmem [#allocation6], %s1211_s17 }
  0x49   : > { %s292_s26 = sshll.u32 %s285_s7, 4  ;;  %p2441_p2 = scmp.lt.s32.totalorder %s1648_s12, 4  ;;  %s1892_s26 = int_to_ptr.vmem [resolvable:$true] %s292_s26 }
  0x4a   : > { %s1900_s18 = scalar_lea.sflag [#allocation7], %s281_s16  ;;  %s1492_s19 = scalar_lea.hbm %s1890_s25, 1024 }
  0x4b   : > { %p1896_p5 = pnand %p2441_p2, %p104_p3  ;;  %p1493_p9 = scmp.ne.s32.totalorder %s1890_s25, %s1492_s19 }
  0x4c   : > { %s1497_s24 = scalar_lea.hbm %s2403_s2, 2048  ;;  %p1498_p1 = scmp.lt.u32.totalorder %s1890_s25, %s2403_s2 }
  0x4d   : > { %p1494_p12 = pneg %p1896_p5  ;;  %p1499_p13 = scmp.lt.u32.totalorder %s1497_s24, %s1492_s19 }
  0x4e   : > { %p1501_p3 = scmp.lt.u32.totalorder %s1492_s19, %s1890_s25 }
  0x4f   : > { %p1495_p0 = pnand %p1494_p12, %p1493_p9  ;;  %p1500_p6 = por %p1499_p13, %p1498_p1 }
  0x51   : > { %p1496_p4 = pneg %p1495_p0  ;;  %p1502_p2 = por %p1501_p3, %p1500_p6 }
  0x53   : > { %p1503_p8 = pnand %p1502_p2, %p1496_p4 }
  0x55   : > { %1506 = shalt.err (!%p1503_p8)
}
  0x56   : > { %s1507_s16 = scalar_lea.vmem %s1892_s26, 1024  ;;  %s1654_s17 = smov [#allocation6]  }
  0x57   : > { %p1508_p9 = scmp.ne.s32.totalorder %s1892_s26, %s1507_s16  ;;  %s1512_s13 = sshll.u32 %s1654_s17, 4  ;;  %s1513_s13 = int_to_ptr.vmem [resolvable:$false] %s1512_s13 }
  0x58   : > { %s1514_s22 = scalar_lea.vmem %s1513_s13, 2048  ;;  %p1515_p7 = scmp.lt.s32.totalorder %s1892_s26, %s1513_s13 }
  0x59   : > { %p1510_p0 = pnand %p1508_p9, %p1494_p12  ;;  %p1516_p1 = scmp.lt.s32.totalorder %s1514_s22, %s1507_s16 }
  0x5b   : > { %p1511_p11 = pneg %p1510_p0  ;;  %p1517_p13 = por %p1516_p1, %p1515_p7 }
  0x5d   : > { %p1518_p6 = pnand %p1517_p13, %p1511_p11 }
  0x5f   : > { %1521 = shalt.err (!%p1518_p6)
}
  0x60   : > { %s1655_s19 = smov 16   ;;  %304 = sbr.rel (%p1856_p10) target bundleno = 1233 (0x4d1), region = 48 }
  0x61   : > { %1253 = dma.hbm_to_vmem [thread:$0]  (!%p1896_p5), %s1890_s25, 1024, %s1892_s26, %s1900_s18, %s1651_s9, %s1651_s9, %s1655_s19  }
  0x62   : > { %s1933_s24 = sand.u32 (!%p1856_p10), 1, %s1624_s30   ;;  %p2443_p8 = scmp.ne.s32.totalorder (!%p1856_p10), %s2438_s23, 0 }
  0x63   : > { %s1215_s7 = sshll.u32 (!%p1856_p10), %s1933_s24, 5  ;;  %s307_s16 = scalar_lea.sflag (!%p1856_p10), [#allocation4], %s1933_s24 }
  0x64   : > { %s1939_s0 = scalar_lea.vmem (!%p1856_p10), [#allocation3], %s1215_s7 }
  0x67   : > { %1595 = dma.done.wait (%p2443_p8), %s307_s16, 512  }
  0x68   : > { %1597 = vsyncadd (%p2443_p8), %s307_s16, 4294966784  ;;  %s315_s9 = sand.u32 1, %s1612_s27   ;;  %p2444_p10 = scmp.ne.s32.totalorder %s2440_s21, 0 }
  0x69   : > { %s1216_s15 = sshll.u32 %s315_s9, 6  ;;  %s316_s25 = scalar_lea.sflag [#allocation7], %s315_s9 }
  0x6a   : > { %s319_s26 = scalar_lea.vmem [#allocation6], %s1216_s15 }
  0x6b   : > { %1599 = dma.done.wait (%p2444_p10), %s316_s25, 1024  }
  0x6c   : > { %1601 = vsyncadd (%p2444_p10), %s316_s25, 4294966272  ;;  %v1656_v0 = vmov 0   ;;  %v361_v1 = vld [vmem:[%s319_s26 + $0x8] sm:$0xff]  ;;  %v363_v2 = vld [vmem:[%s319_s26 + $0x18] sm:$0xff]  ;;  %vm388_vm0 = vcmask 261120   ;;  %v497_v47 = vlaneseq  ;;  %s2445_s19 = sld [smem:[#allocation13_spill]] }
  0x6d   : > { %427 = vmatprep.mubr.bf16.mxu0 %v1656_v0  ;;  %577 = vmatprep.mubr.bf16.mxu1 %v1656_v0  ;;  %v360_v3 = vld [vmem:[%s319_s26] sm:$0xff]  ;;  %v371_v4 = vpack.c.bf16 %v363_v2, %v361_v1  ;;  %v362_v5 = vld [vmem:[%s319_s26 + $0x10] sm:$0xff]  ;;  %v365_v6 = vld [vmem:[%s319_s26 + $0x28] sm:$0xff]  ;;  %s2446_s16 = sld [smem:[#allocation12_spill]]  ;;  %s1064_s9 = sld [smem:[#allocation2]] }
  0x6e   : > { %1356 = vset.pattern.permute.xlu1 %v1656_v0  ;;  %v367_v7 = vld [vmem:[%s319_s26 + $0x38] sm:$0xff]  ;;  %v370_v8 = vpack.c.bf16 %v362_v5, %v360_v3  ;;  %v364_v10 = vld [vmem:[%s319_s26 + $0x20] sm:$0xff]  ;;  %v366_v11 = vld [vmem:[%s319_s26 + $0x30] sm:$0xff]  ;;  %v498_v48 = vshrl.u32 %v497_v47, 7  ;;  %s354_s25 = scalar_lea.vmem [#allocation8], %s1215_s7  ;;  %s2447_s21 = sld [smem:[#allocation16_spill]] }
  0x6f   : > { %v373_v9 = vpack.c.bf16 %v367_v7, %v365_v6  ;;  %395 = vmatprep.subr.bf16.mxu0 %v371_v4  ;;  %v372_v12 = vpack.c.bf16 %v366_v11, %v364_v10  ;;  %v356_v13 = vld [vmem:[%s1939_s0] sm:$0xff]  ;;  %v357_v14 = vld [vmem:[%s1939_s0 + $0x8] sm:$0xff]  ;;  %v358_v15 = vld [vmem:[%s1939_s0 + $0x10] sm:$0xff]  ;;  %s1093_s23 = sshll.u32 %s354_s25, 4  ;;  %s2448_s13 = sld [smem:[#allocation18_spill]]  ;;  %s2331_s23 = int_to_ptr.vmem [resolvable:$true] %s1093_s23 }
  0x70   : > { %396 = vmatpush1.bf16.msra.mxu0 %v370_v8  ;;  %v359_v16 = vld [vmem:[%s1939_s0 + $0x18] sm:$0xff]  ;;  %v368_v17 = vpack.c.bf16 %v357_v14, %v356_v13  ;;  %v1358_v18 = vld [vmem:[%s2404_s3] sm:$0xff]   ;;  %v1359_v20 = vld [vmem:[%s2404_s3 + $0x8] sm:$0xff]   ;;  %v499_v49 = vsub.s32 0, %v498_v48 }
  0x71   : > { %397 = vmatprep.subr.bf16.mxu0 %v373_v9  ;;  %v369_v19 = vpack.c.bf16 %v359_v16, %v358_v15  ;;  %v452_v21 = vld [vmem:[%s2405_s4] sm:$0x1] }
  0x72   : > { %505 = vxpose.xlu0.c.b16.start [1/2] (short) %v368_v17, 128  ;;  %v1360_v46 = vld [vmem:[%s2406_s5] sm:$0xff]   ;;  %s1236_s15 = sshll.u32 %s2445_s19, 3  ;;  %s1079_s19 = scalar_lea.sflag [#allocation5], %s1933_s24 }
  0x73   : > { %s1090_s26 = sadd.s32 %s2446_s16, %s1236_s15  ;;  %s1522_s16 = scalar_lea.vmem %s2331_s23, 512 }
  0x74   : > { %398 = vmatpush1.bf16.msra.mxu0 %v372_v12  ;;  %s1237_s18 = sshll.u32 %s1090_s26, 7  ;;  %p1523_p7 = scmp.ne.s32.totalorder %s2331_s23, %s1522_s16 }
  0x75   : > { %456 = vmatprep.subr.bf16.mxu0 %v371_v4  ;;  %s2337_s22 = scalar_lea.hbm %s2448_s13, %s1237_s18  ;;  %p2449_p11 = scmp.ne.s32.totalorder %s2447_s21, 0 }
  0x76   : > { %506 = vxpose.xlu0.c.b16.end [2/2] (short) %v369_v19, 128 }
  0x77   : > { %1220 = vmatmul.mubr.msk.bf16.vlgmr.msra.gmra.mrb[0].mxu0 %vm388_vm0, %v1358_v18  ;;  %p1524_p5 = pnand %p1523_p7, %p2449_p11 }
  0x78   : > { %437 = vmatprep.mubr.bf16.mxu0 %v1656_v0  ;;  %457 = vmatpush1.bf16.msra.mxu0 %v370_v8 }
  0x79   : > { %458 = vmatprep.subr.bf16.mxu0 %v373_v9  ;;  %p1525_p12 = pneg %p1524_p5 }
  0x7c   : > { %459 = vmatpush1.bf16.msra.mxu0 %v372_v12 }
  0x7d   : > { %702 = vmatprep.subr.bf16.mxu0 %v371_v4 }
  0x7f   : > { %1221 = vmatmul.mubr.msk.bf16.gmra.mrb[4].mxu0 %vm388_vm0, %v1359_v20  ;;  %1357 = vset.pattern.permute.xlu0 %v1656_v0 }
  0x80   : > { %488 = vmatprep.mubr.bf16.mxu0 %v1656_v0 }
  0x87   : > { %1222 = vmatmul.mubr.msk.bf16.vlgmr.msra.gmra.mrb[8].mxu0 %vm388_vm0, %v452_v21 }
  0x88   : > { %703 = vmatpush1.bf16.msra.mxu0 %v370_v8  ;;  %734 = vmatprep.mubr.bf16.mxu0 %v1656_v0 }
  0x89   : > { %704 = vmatprep.subr.bf16.mxu0 %v373_v9 }
  0x8c   : > { %705 = vmatpush1.bf16.msra.mxu0 %v372_v12 }
  0x8f   : > { %1233 = vmatmul.mubr.msk.bf16.vlgmr.msra.gmra.mrb[12].mxu0 %vm388_vm0, %v1360_v46 }
  0x90   : > { %744 = vmatprep.mubr.bf16.mxu0 %v1656_v0 }
  0xd8   : > { %v513_v34 = vpop.trf.xlu0 }
  0xdc   : > { %v514_v35 = vpop.trf.xlu0 }
  0xe0   : > { %v515_v36 = vpop.trf.xlu0 }
  0xe4   : > { %v516_v37 = vpop.trf.xlu0 }
  0xe8   : > { %v517_v38 = vpop.trf.xlu0 }
  0xec   : > { %v518_v39 = vpop.trf.xlu0 }
  0xf0   : > { %v519_v40 = vpop.trf.xlu0 }
  0xf4   : > { %v520_v41 = vpop.trf.xlu0 }
 0x14a   : > { %v429_v22 = vpop.f32.mrb[0].mxu0 }
 0x14b   : > { %v431_v23 = vpop.f32.mrb[1].mxu0 }
 0x14c   : > { %v433_v24 = vpop.f32.mrb[2].mxu0 }
 0x14d   : > { %v448_v25 = vpack.c.bf16 %v433_v24, %v429_v22  ;;  %v435_v26 = vpop.f32.mrb[3].mxu0 }
 0x14e   : > { %v449_v27 = vpack.c.bf16 %v435_v26, %v431_v23 }
 0x150   : > { %545 = vmatprep.subr.bf16.mxu1 %v449_v27 }
 0x151   : > { %546 = vmatpush1.bf16.msra.mxu1 %v448_v25 }
 0x152   : > { %v439_v28 = vpop.f32.mrb[4].mxu0 }
 0x153   : > { %v441_v29 = vpop.f32.mrb[5].mxu0 }
 0x154   : > { %v443_v30 = vpop.f32.mrb[6].mxu0 }
 0x155   : > { %v450_v31 = vpack.c.bf16 %v443_v30, %v439_v28  ;;  %v445_v32 = vpop.f32.mrb[7].mxu0 }
 0x156   : > { %v451_v33 = vpack.c.bf16 %v445_v32, %v441_v29 }
 0x158   : > { %547 = vmatprep.subr.bf16.mxu1 %v451_v33 }
 0x159   : > { %548 = vmatpush1.bf16.msra.mxu1 %v450_v31 }
 0x15a   : > { %v490_v42 = vpop.f32.mrb[8].mxu0 }
 0x15b   : > { %v492_v43 = vpop.f32.mrb[9].mxu0  ;;  %v1993_v50 = vrot.slane %v490_v42, %v499_v49 }
 0x15c   : > { %1223 = vmatmul.mubr.msk.bf16.vlgmr.msra.gmra.mrb[0].mxu1 %vm388_vm0, %v513_v34  ;;  %v494_v44 = vpop.f32.mrb[10].mxu0  ;;  %v1995_v51 = vrot.slane %v492_v43, %v499_v49 }
 0x15d   : > { %587 = vmatprep.mubr.bf16.mxu1 %v1656_v0  ;;  %v495_v45 = vpop.f32.mrb[11].mxu0 }
 0x164   : > { %1224 = vmatmul.mubr.msk.bf16.gmra.mrb[4].mxu1 %vm388_vm0, %v514_v35 }
 0x165   : > { %597 = vmatprep.mubr.bf16.mxu1 %v1656_v0 }
 0x16c   : > { %1225 = vmatmul.mubr.msk.bf16.gmra.mrb[8].mxu1 %vm388_vm0, %v515_v36 }
 0x16d   : > { %607 = vmatprep.mubr.bf16.mxu1 %v1656_v0 }
 0x174   : > { %1226 = vmatmul.mubr.msk.bf16.gmra.mrb[12].mxu1 %vm388_vm0, %v516_v37 }
 0x175   : > { %617 = vmatprep.mubr.bf16.mxu1 %v1656_v0 }
 0x17c   : > { %1227 = vmatmul.mubr.msk.bf16.gmra.mrb[16].mxu1 %vm388_vm0, %v517_v38 }
 0x17d   : > { %627 = vmatprep.mubr.bf16.mxu1 %v1656_v0 }
 0x184   : > { %1228 = vmatmul.mubr.msk.bf16.gmra.mrb[20].mxu1 %vm388_vm0, %v518_v39 }
 0x185   : > { %637 = vmatprep.mubr.bf16.mxu1 %v1656_v0 }
 0x18c   : > { %1229 = vmatmul.mubr.msk.bf16.gmra.mrb[24].mxu1 %vm388_vm0, %v519_v40 }
 0x18d   : > { %647 = vmatprep.mubr.bf16.mxu1 %v1656_v0 }
 0x194   : > { %1230 = vmatmul.mubr.msk.bf16.gmra.mrb[28].mxu1 %vm388_vm0, %v520_v41 }
 0x22f   : > { %v579_v52 = vpop.f32.mrb[0].mxu1 }
 0x230   : > { %v1998_v53 = vadd.f32 %v579_v52, %v1993_v50  ;;  %v581_v54 = vpop.f32.mrb[1].mxu1 }
 0x231   : > { %v2001_v55 = vadd.f32 %v581_v54, %v1995_v51  ;;  %v583_v56 = vpop.f32.mrb[2].mxu1 }
 0x232   : > { %v2004_v57 = vadd.f32 %v583_v56, %v1993_v50  ;;  %v585_v58 = vpop.f32.mrb[3].mxu1 }
 0x233   : > { %v2007_v59 = vadd.f32 %v585_v58, %v1995_v51  ;;  %v755_v60 = vmax.f32 %v1998_v53, %v2001_v55 }
 0x235   : > { %756 = vmax.xlane.f32.xlu1 %v755_v60  ;;  %v758_v62 = vmax.f32 %v2004_v57, %v2007_v59 }
 0x237   : > { %v589_v61 = vpop.f32.mrb[4].mxu1 }
 0x238   : > { %v2014_v63 = vadd.f32 %v589_v61, %v1993_v50  ;;  %v591_v0 = vpop.f32.mrb[5].mxu1 }
 0x239   : > { %v2017_v1 = vadd.f32 %v591_v0, %v1995_v51  ;;  %759 = vmax.xlane.f32.xlu1 %v758_v62  ;;  %v593_v2 = vpop.f32.mrb[6].mxu1 }
 0x23a   : > { %v2020_v3 = vadd.f32 %v593_v2, %v1993_v50  ;;  %v595_v4 = vpop.f32.mrb[7].mxu1 }
 0x23b   : > { %v2023_v5 = vadd.f32 %v595_v4, %v1995_v51  ;;  %v761_v6 = vmax.f32 %v2014_v63, %v2017_v1 }
 0x23d   : > { %762 = vmax.xlane.f32.xlu0 %v761_v6  ;;  %v764_v7 = vmax.f32 %v2020_v3, %v2023_v5 }
 0x23f   : > { %765 = vmax.xlane.f32.xlu1 %v764_v7  ;;  %v599_v8 = vpop.f32.mrb[8].mxu1 }
 0x240   : > { %v2030_v9 = vadd.f32 %v599_v8, %v1993_v50  ;;  %v601_v10 = vpop.f32.mrb[9].mxu1 }
 0x241   : > { %v2033_v11 = vadd.f32 %v601_v10, %v1995_v51  ;;  %v603_v12 = vpop.f32.mrb[10].mxu1 }
 0x242   : > { %v2036_v13 = vadd.f32 %v603_v12, %v1993_v50  ;;  %v605_v14 = vpop.f32.mrb[11].mxu1 }
 0x243   : > { %v2039_v15 = vadd.f32 %v605_v14, %v1995_v51  ;;  %v767_v16 = vmax.f32 %v2030_v9, %v2033_v11 }
 0x245   : > { %768 = vmax.xlane.f32.xlu1 %v767_v16  ;;  %v770_v18 = vmax.f32 %v2036_v13, %v2039_v15 }
 0x247   : > { %v609_v17 = vpop.f32.mrb[12].mxu1 }
 0x248   : > { %v2046_v19 = vadd.f32 %v609_v17, %v1993_v50  ;;  %v611_v20 = vpop.f32.mrb[13].mxu1 }
 0x249   : > { %v2049_v21 = vadd.f32 %v611_v20, %v1995_v51  ;;  %771 = vmax.xlane.f32.xlu1 %v770_v18  ;;  %v613_v22 = vpop.f32.mrb[14].mxu1  ;;  %v1361_v18 = vld [vmem:[%s2406_s5 + $0x8] sm:$0xff]  }
 0x24a   : > { %v2052_v23 = vadd.f32 %v613_v22, %v1993_v50  ;;  %v615_v24 = vpop.f32.mrb[15].mxu1  ;;  %1234 = vmatmul.mubr.msk.bf16.gmra.mrb[16].mxu0 %vm388_vm0, %v1361_v18 }
 0x24b   : > { %v2055_v25 = vadd.f32 %v615_v24, %v1995_v51  ;;  %v773_v26 = vmax.f32 %v2046_v19, %v2049_v21 }
 0x24d   : > { %774 = vmax.xlane.f32.xlu1 %v773_v26  ;;  %v776_v28 = vmax.f32 %v2052_v23, %v2055_v25 }
 0x24f   : > { %v619_v27 = vpop.f32.mrb[16].mxu1 }
 0x250   : > { %v2062_v29 = vadd.f32 %v619_v27, %v1993_v50  ;;  %v621_v30 = vpop.f32.mrb[17].mxu1 }
 0x251   : > { %v2065_v31 = vadd.f32 %v621_v30, %v1995_v51  ;;  %777 = vmax.xlane.f32.xlu1 %v776_v28  ;;  %v623_v32 = vpop.f32.mrb[18].mxu1 }
 0x252   : > { %v2068_v33 = vadd.f32 %v623_v32, %v1993_v50  ;;  %v625_v34 = vpop.f32.mrb[19].mxu1 }
 0x253   : > { %v2071_v35 = vadd.f32 %v625_v34, %v1995_v51  ;;  %v779_v36 = vmax.f32 %v2062_v29, %v2065_v31 }
 0x255   : > { %780 = vmax.xlane.f32.xlu1 %v779_v36  ;;  %v782_v38 = vmax.f32 %v2068_v33, %v2071_v35 }
 0x257   : > { %v629_v37 = vpop.f32.mrb[20].mxu1 }
 0x258   : > { %v2078_v39 = vadd.f32 %v629_v37, %v1993_v50  ;;  %v631_v40 = vpop.f32.mrb[21].mxu1 }
 0x259   : > { %v2081_v41 = vadd.f32 %v631_v40, %v1995_v51  ;;  %783 = vmax.xlane.f32.xlu1 %v782_v38  ;;  %v633_v42 = vpop.f32.mrb[22].mxu1 }
 0x25a   : > { %v2084_v43 = vadd.f32 %v633_v42, %v1993_v50  ;;  %v635_v44 = vpop.f32.mrb[23].mxu1 }
 0x25b   : > { %v2087_v45 = vadd.f32 %v635_v44, %v1995_v51  ;;  %v785_v46 = vmax.f32 %v2078_v39, %v2081_v41 }
 0x25d   : > { %786 = vmax.xlane.f32.xlu1 %v785_v46  ;;  %v788_v48 = vmax.f32 %v2084_v43, %v2087_v45 }
 0x25f   : > { %v639_v47 = vpop.f32.mrb[24].mxu1 }
 0x260   : > { %v2094_v49 = vadd.f32 %v639_v47, %v1993_v50  ;;  %v641_v52 = vpop.f32.mrb[25].mxu1 }
 0x261   : > { %v2097_v54 = vadd.f32 %v641_v52, %v1995_v51  ;;  %789 = vmax.xlane.f32.xlu1 %v788_v48  ;;  %v643_v56 = vpop.f32.mrb[26].mxu1 }
 0x262   : > { %v2100_v58 = vadd.f32 %v643_v56, %v1993_v50  ;;  %v645_v60 = vpop.f32.mrb[27].mxu1 }
 0x263   : > { %v2103_v61 = vadd.f32 %v645_v60, %v1995_v51  ;;  %v791_v62 = vmax.f32 %v2094_v49, %v2097_v54 }
 0x265   : > { %792 = vmax.xlane.f32.xlu1 %v791_v62  ;;  %v794_v0 = vmax.f32 %v2100_v58, %v2103_v61 }
 0x267   : > { %795 = vmax.xlane.f32.xlu0 %v794_v0  ;;  %v649_v2 = vpop.f32.mrb[28].mxu1 }
 0x268   : > { %v2110_v4 = vadd.f32 %v649_v2, %v1993_v50  ;;  %v651_v6 = vpop.f32.mrb[29].mxu1 }
 0x269   : > { %v2113_v7 = vadd.f32 %v651_v6, %v1995_v51  ;;  %v653_v8 = vpop.f32.mrb[30].mxu1 }
 0x26a   : > { %v2116_v10 = vadd.f32 %v653_v8, %v1993_v50  ;;  %v655_v12 = vpop.f32.mrb[31].mxu1 }
 0x26b   : > { %v2119_v14 = vadd.f32 %v655_v12, %v1995_v51  ;;  %v797_v16 = vmax.f32 %v2110_v4, %v2113_v7 }
 0x26d   : > { %798 = vmax.xlane.f32.xlu1 %v797_v16  ;;  %v800_v17 = vmax.f32 %v2116_v10, %v2119_v14 }
 0x26f   : > { %801 = vmax.xlane.f32.xlu0 %v800_v17 }
 0x2c2   : > { %v757_v50 = vpop.xlane.xlu1 %756 }
 0x2c3   : > { %v803_v20 = vsub.f32 %v1998_v53, %v757_v50  ;;  %v804_v51 = vsub.f32 %v2001_v55, %v757_v50 }
 0x2c5   : > { %v835_v22 = vmul.f32 1.442695, %v803_v20  ;;  %v837_v24 = vmul.f32 1.442695, %v804_v51 }
 0x2c6   : > { %v760_v26 = vpop.xlane.xlu1 %759 }
 0x2c7   : > { %1362 = vpow2.f32 %v835_v22  ;;  %v805_v27 = vsub.f32 %v2004_v57, %v760_v26  ;;  %v806_v28 = vsub.f32 %v2007_v59, %v760_v26 }
 0x2c8   : > { %1364 = vpow2.f32 %v837_v24 }
 0x2c9   : > { %v839_v30 = vmul.f32 1.442695, %v805_v27  ;;  %v841_v32 = vmul.f32 1.442695, %v806_v28 }
 0x2ca   : > { %v763_v34 = vpop.xlane.xlu0 %762 }
 0x2cb   : > { %1366 = vpow2.f32 %v839_v30  ;;  %v807_v36 = vsub.f32 %v2014_v63, %v763_v34  ;;  %v808_v37 = vsub.f32 %v2017_v1, %v763_v34 }
 0x2cc   : > { %1368 = vpow2.f32 %v841_v32  ;;  %v766_v53 = vpop.xlane.xlu1 %765 }
 0x2cd   : > { %v843_v55 = vmul.f32 1.442695, %v807_v36  ;;  %v845_v38 = vmul.f32 1.442695, %v808_v37  ;;  %v809_v40 = vsub.f32 %v2020_v3, %v766_v53  ;;  %v810_v42 = vsub.f32 %v2023_v5, %v766_v53 }
 0x2cf   : > { %1370 = vpow2.f32 %v843_v55  ;;  %v847_v57 = vmul.f32 1.442695, %v809_v40  ;;  %v849_v59 = vmul.f32 1.442695, %v810_v42 }
 0x2d0   : > { %1372 = vpow2.f32 %v845_v38 }
 0x2d1   : > { %v2137_v44 = vpop.eup %1362  ;;  %1374 = vpow2.f32 %v847_v57 }
 0x2d2   : > { %v2139_v46 = vpop.eup %1364  ;;  %1376 = vpow2.f32 %v849_v59  ;;  %v769_v63 = vpop.xlane.xlu1 %768 }
 0x2d3   : > { %v811_v1 = vsub.f32 %v2030_v9, %v769_v63  ;;  %v812_v47 = vsub.f32 %v2033_v11, %v769_v63  ;;  %v899_v3 = vadd.f32 %v2139_v46, %v2137_v44 }
 0x2d5   : > { %v2145_v48 = vpop.eup %1366  ;;  %v851_v5 = vmul.f32 1.442695, %v811_v1  ;;  %v853_v52 = vmul.f32 1.442695, %v812_v47  ;;  %900 = vadd.xlane.f32.xlu1 %v899_v3 }
 0x2d6   : > { %v2147_v56 = vpop.eup %1368  ;;  %v772_v60 = vpop.xlane.xlu1 %771 }
 0x2d7   : > { %1378 = vpow2.f32 %v851_v5  ;;  %v813_v62 = vsub.f32 %v2036_v13, %v772_v60  ;;  %v814_v0 = vsub.f32 %v2039_v15, %v772_v60  ;;  %v902_v9 = vadd.f32 %v2147_v56, %v2145_v48 }
 0x2d8   : > { %1380 = vpow2.f32 %v853_v52 }
 0x2d9   : > { %v2153_v11 = vpop.eup %1370  ;;  %v855_v2 = vmul.f32 1.442695, %v813_v62  ;;  %v857_v6 = vmul.f32 1.442695, %v814_v0  ;;  %903 = vadd.xlane.f32.xlu0 %v902_v9 }
 0x2da   : > { %v2155_v8 = vpop.eup %1372  ;;  %v775_v12 = vpop.xlane.xlu1 %774 }
 0x2db   : > { %v2157_v16 = vpop.eup %1374  ;;  %1382 = vpow2.f32 %v855_v2  ;;  %v815_v17 = vsub.f32 %v2046_v19, %v775_v12  ;;  %v816_v13 = vsub.f32 %v2049_v21, %v775_v12  ;;  %v905_v15 = vadd.f32 %v2155_v8, %v2153_v11 }
 0x2dc   : > { %v2163_v18 = vpop.eup %1376  ;;  %1384 = vpow2.f32 %v857_v6 }
 0x2dd   : > { %v859_v50 = vmul.f32 1.442695, %v815_v17  ;;  %v861_v20 = vmul.f32 1.442695, %v816_v13  ;;  %906 = vadd.xlane.f32.xlu1 %v905_v15  ;;  %v908_v51 = vadd.f32 %v2163_v18, %v2157_v16 }
 0x2de   : > { %v778_v22 = vpop.xlane.xlu1 %777 }
 0x2df   : > { %1386 = vpow2.f32 %v859_v50  ;;  %v817_v24 = vsub.f32 %v2052_v23, %v778_v22  ;;  %v818_v19 = vsub.f32 %v2055_v25, %v778_v22  ;;  %909 = vadd.xlane.f32.xlu0 %v908_v51 }
 0x2e0   : > { %1388 = vpow2.f32 %v861_v20 }
 0x2e1   : > { %v2169_v21 = vpop.eup %1378  ;;  %v863_v26 = vmul.f32 1.442695, %v817_v24  ;;  %v865_v27 = vmul.f32 1.442695, %v818_v19 }
 0x2e2   : > { %v2171_v28 = vpop.eup %1380  ;;  %v781_v30 = vpop.xlane.xlu1 %780 }
 0x2e3   : > { %1390 = vpow2.f32 %v863_v26  ;;  %v819_v32 = vsub.f32 %v2062_v29, %v781_v30  ;;  %v820_v34 = vsub.f32 %v2065_v31, %v781_v30  ;;  %v911_v36 = vadd.f32 %v2171_v28, %v2169_v21 }
 0x2e4   : > { %1392 = vpow2.f32 %v865_v27 }
 0x2e5   : > { %v2177_v23 = vpop.eup %1382  ;;  %v867_v25 = vmul.f32 1.442695, %v819_v32  ;;  %v869_v37 = vmul.f32 1.442695, %v820_v34  ;;  %912 = vadd.xlane.f32.xlu1 %v911_v36 }
 0x2e6   : > { %v2179_v53 = vpop.eup %1384  ;;  %v784_v55 = vpop.xlane.xlu1 %783 }
 0x2e7   : > { %1394 = vpow2.f32 %v867_v25  ;;  %v821_v38 = vsub.f32 %v2068_v33, %v784_v55  ;;  %v822_v40 = vsub.f32 %v2071_v35, %v784_v55  ;;  %v914_v29 = vadd.f32 %v2179_v53, %v2177_v23 }
 0x2e8   : > { %1396 = vpow2.f32 %v869_v37 }
 0x2e9   : > { %v2185_v31 = vpop.eup %1386  ;;  %v871_v42 = vmul.f32 1.442695, %v821_v38  ;;  %v873_v57 = vmul.f32 1.442695, %v822_v40  ;;  %915 = vadd.xlane.f32.xlu0 %v914_v29  ;;  %v2240_v38 = vpop.f32.mrb[12].mxu0 }
 0x2ea   : > { %v2187_v59 = vpop.eup %1388  ;;  %v787_v63 = vpop.xlane.xlu1 %786 }
 0x2eb   : > { %1398 = vpow2.f32 %v871_v42  ;;  %v823_v1 = vsub.f32 %v2078_v39, %v787_v63  ;;  %v824_v47 = vsub.f32 %v2081_v41, %v787_v63  ;;  %v917_v33 = vadd.f32 %v2187_v59, %v2185_v31  ;;  %v2244_v29 = vpop.f32.mrb[13].mxu0 }
 0x2ec   : > { %1400 = vpow2.f32 %v873_v57 }
 0x2ed   : > { %v2193_v35 = vpop.eup %1390  ;;  %v875_v3 = vmul.f32 1.442695, %v823_v1  ;;  %v877_v5 = vmul.f32 1.442695, %v824_v47  ;;  %918 = vadd.xlane.f32.xlu1 %v917_v33 }
 0x2ee   : > { %v2195_v52 = vpop.eup %1392  ;;  %v790_v60 = vpop.xlane.xlu1 %789 }
 0x2ef   : > { %1402 = vpow2.f32 %v875_v3  ;;  %v825_v62 = vsub.f32 %v2084_v43, %v790_v60  ;;  %v826_v0 = vsub.f32 %v2087_v45, %v790_v60  ;;  %v920_v39 = vadd.f32 %v2195_v52, %v2193_v35 }
 0x2f0   : > { %1404 = vpow2.f32 %v877_v5 }
 0x2f1   : > { %v2201_v41 = vpop.eup %1394  ;;  %v879_v9 = vmul.f32 1.442695, %v825_v62  ;;  %v881_v2 = vmul.f32 1.442695, %v826_v0  ;;  %921 = vadd.xlane.f32.xlu0 %v920_v39  ;;  %v2252_v62 = vpop.f32.mrb[14].mxu0 }
 0x2f2   : > { %v2203_v6 = vpop.eup %1396  ;;  %v793_v57 = vpop.xlane.xlu1 %792 }
 0x2f3   : > { %1406 = vpow2.f32 %v879_v9  ;;  %v923_v12 = vadd.f32 %v2203_v6, %v2201_v41  ;;  %v827_v63 = vsub.f32 %v2094_v49, %v793_v57  ;;  %v828_v1 = vsub.f32 %v2097_v54, %v793_v57  ;;  %v2254_v0 = vpop.f32.mrb[15].mxu0  ;;  %v663_v9 = vld [vmem:[%s2407_s6 + $0x8] sm:$0xff] }
 0x2f4   : > { %1408 = vpow2.f32 %v881_v2  ;;  %v796_v17 = vpop.xlane.xlu0 %795 }
 0x2f5   : > { %v2207_v43 = vpop.eup %1398  ;;  %924 = vadd.xlane.f32.xlu1 %v923_v12  ;;  %v829_v45 = vsub.f32 %v2100_v58, %v796_v17  ;;  %v830_v13 = vsub.f32 %v2103_v61, %v796_v17  ;;  %v883_v33 = vmul.f32 1.442695, %v827_v63  ;;  %v885_v5 = vmul.f32 1.442695, %v828_v1 }
 0x2f6   : > { %v2211_v15 = vpop.eup %1400 }
 0x2f7   : > { %v887_v50 = vmul.f32 1.442695, %v829_v45  ;;  %v889_v20 = vmul.f32 1.442695, %v830_v13  ;;  %v926_v51 = vadd.f32 %v2211_v15, %v2207_v43  ;;  %v664_v45 = vld [vmem:[%s2407_s6 + $0x10] sm:$0xff] }
 0x2f9   : > { %v2215_v22 = vpop.eup %1402  ;;  %1410 = vpow2.f32 %v887_v50  ;;  %927 = vadd.xlane.f32.xlu0 %v926_v51 }
 0x2fa   : > { %v2217_v24 = vpop.eup %1404  ;;  %1412 = vpow2.f32 %v889_v20  ;;  %v799_v47 = vpop.xlane.xlu1 %798  ;;  %v665_v20 = vld [vmem:[%s2407_s6 + $0x18] sm:$0xff] }
 0x2fb   : > { %v929_v19 = vadd.f32 %v2217_v24, %v2215_v22  ;;  %v831_v3 = vsub.f32 %v2110_v4, %v799_v47  ;;  %v832_v60 = vsub.f32 %v2113_v7, %v799_v47 }
 0x2fc   : > { %v802_v58 = vpop.xlane.xlu0 %801 }
 0x2fd   : > { %v2221_v26 = vpop.eup %1406  ;;  %930 = vadd.xlane.f32.xlu1 %v929_v19  ;;  %v833_v61 = vsub.f32 %v2116_v10, %v802_v58  ;;  %v834_v27 = vsub.f32 %v2119_v14, %v802_v58  ;;  %v662_v14 = vld [vmem:[%s2407_s6] sm:$0xff]  ;;  %v891_v39 = vmul.f32 1.442695, %v831_v3  ;;  %v893_v49 = vmul.f32 1.442695, %v832_v60 }
 0x2fe   : > { %v2225_v30 = vpop.eup %1408 }
 0x2ff   : > { %v895_v32 = vmul.f32 1.442695, %v833_v61  ;;  %v897_v34 = vmul.f32 1.442695, %v834_v27  ;;  %v932_v36 = vadd.f32 %v2225_v30, %v2221_v26 }
 0x301   : > { %1414 = vpow2.f32 %v895_v32  ;;  %933 = vadd.xlane.f32.xlu0 %v932_v36 }
 0x302   : > { %1416 = vpow2.f32 %v897_v34 }
 0x303   : > { %v2229_v25 = vpop.eup %1410  ;;  %1418 = vpow2.f32 %v883_v33 }
 0x304   : > { %v2231_v37 = vpop.eup %1412  ;;  %1420 = vpow2.f32 %v885_v5 }
 0x305   : > { %v938_v55 = vadd.f32 %v2231_v37, %v2229_v25  ;;  %1422 = vpow2.f32 %v891_v39 }
 0x306   : > { %1424 = vpow2.f32 %v893_v49 }
 0x307   : > { %939 = vadd.xlane.f32.xlu0 %v938_v55 }
 0x30b   : > { %v2235_v10 = vpop.eup %1414 }
 0x30c   : > { %v2242_v40 = vpop.eup %1416 }
 0x30d   : > { %v944_v42 = vadd.f32 %v2242_v40, %v2235_v10  ;;  %v2259_v54 = vpop.eup %1418 }
 0x30e   : > { %668 = vperm.xlu1 %1356, %v662_v14   ;;  %v2261_v4 = vpop.eup %1420 }
 0x30f   : > { %945 = vadd.xlane.f32.xlu0 %v944_v42  ;;  %v2263_v7 = vpop.eup %1422  ;;  %v935_v2 = vadd.f32 %v2261_v4, %v2259_v54 }
 0x310   : > { %v2267_v12 = vpop.eup %1424 }
 0x311   : > { %v941_v17 = vadd.f32 %v2267_v12, %v2263_v7 }
 0x31d   : > { %v2274_v13 = vpop.f32.mrb[16].mxu0 }
 0x31e   : > { %v2276_v50 = vpop.f32.mrb[17].mxu0 }
 0x31f   : > { %v2281_v51 = vpop.f32.mrb[18].mxu0 }
 0x320   : > { %v2283_v19 = vpop.f32.mrb[19].mxu0 }
 0x325   : > { %673 = vperm.xlu0 %1357, %v663_v9  }
 0x332   : > { %936 = vadd.xlane.f32.xlu1 %v935_v2 }
 0x336   : > { %942 = vadd.xlane.f32.xlu1 %v941_v17 }
 0x347   : > { %678 = vperm.xlu1 %1356, %v664_v45  }
 0x34b   : > { %683 = vperm.xlu1 %1356, %v665_v20  }
 0x362   : > { %v901_v58 = vpop.xlane.xlu1 %900 }
 0x363   : > { %1426 = vrcp.f32 %v901_v58 }
 0x366   : > { %v904_v61 = vpop.xlane.xlu0 %903 }
 0x367   : > { %1428 = vrcp.f32 %v904_v61 }
 0x36a   : > { %v907_v27 = vpop.xlane.xlu1 %906 }
 0x36b   : > { %1430 = vrcp.f32 %v907_v27 }
 0x36c   : > { %v910_v32 = vpop.xlane.xlu0 %909 }
 0x36d   : > { %1432 = vrcp.f32 %v910_v32  ;;  %v1427_v34 = vpop.eup %1426 }
 0x36e   : > { %v964_v14 = vmul.f32 %v1427_v34, %v2139_v46  ;;  %v963_v57 = vmul.f32 %v1427_v34, %v2137_v44 }
 0x371   : > { %v1429_v36 = vpop.eup %1428 }
 0x372   : > { %v913_v55 = vpop.xlane.xlu1 %912  ;;  %v966_v42 = vmul.f32 %v1429_v36, %v2147_v56  ;;  %v965_v63 = vmul.f32 %v1429_v36, %v2145_v48 }
 0x373   : > { %1434 = vrcp.f32 %v913_v55 }
 0x374   : > { %v996_v1 = vpack.c.bf16 %v966_v42, %v964_v14  ;;  %v995_v47 = vpack.c.bf16 %v965_v63, %v963_v57 }
 0x375   : > { %v1431_v33 = vpop.eup %1430 }
 0x376   : > { %1015 = vmatprep.subr.bf16.mxu1 %v996_v1  ;;  %v916_v3 = vpop.xlane.xlu0 %915  ;;  %v968_v60 = vmul.f32 %v1431_v33, %v2155_v8  ;;  %v967_v44 = vmul.f32 %v1431_v33, %v2153_v11 }
 0x377   : > { %v1433_v5 = vpop.eup %1432  ;;  %1436 = vrcp.f32 %v916_v3  ;;  %1016 = vmatpush1.bf16.xpose.msra.mxu1 %v995_v47 }
 0x378   : > { %v970_v39 = vmul.f32 %v1433_v5, %v2163_v18  ;;  %v969_v46 = vmul.f32 %v1433_v5, %v2157_v16 }
 0x37a   : > { %v919_v56 = vpop.xlane.xlu1 %918  ;;  %v998_v9 = vpack.c.bf16 %v970_v39, %v968_v60  ;;  %v997_v48 = vpack.c.bf16 %v969_v46, %v967_v44 }
 0x37b   : > { %1438 = vrcp.f32 %v919_v56 }
 0x37c   : > { %1017 = vmatprep.subr.bf16.mxu1 %v998_v9 }
 0x37d   : > { %v1435_v2 = vpop.eup %1434 }
 0x37e   : > { %v922_v49 = vpop.xlane.xlu0 %921  ;;  %v972_v20 = vmul.f32 %v1435_v2, %v2171_v28  ;;  %v971_v18 = vmul.f32 %v1435_v2, %v2169_v21 }
 0x37f   : > { %1440 = vrcp.f32 %v922_v49  ;;  %1018 = vmatpush1.bf16.xpose.msra.mxu1 %v997_v48 }
 0x381   : > { %v1437_v17 = vpop.eup %1436 }
 0x382   : > { %v925_v45 = vpop.xlane.xlu1 %924  ;;  %v974_v8 = vmul.f32 %v1437_v17, %v2179_v53  ;;  %v973_v16 = vmul.f32 %v1437_v17, %v2177_v23 }
 0x383   : > { %1442 = vrcp.f32 %v925_v45 }
 0x384   : > { %v1000_v58 = vpack.c.bf16 %v974_v8, %v972_v20  ;;  %v999_v61 = vpack.c.bf16 %v973_v16, %v971_v18 }
 0x385   : > { %v1439_v27 = vpop.eup %1438 }
 0x386   : > { %1019 = vmatprep.subr.bf16.mxu1 %v1000_v58  ;;  %v928_v11 = vpop.xlane.xlu0 %927  ;;  %v976_v36 = vmul.f32 %v1439_v27, %v2187_v59  ;;  %v975_v53 = vmul.f32 %v1439_v27, %v2185_v31 }
 0x387   : > { %1444 = vrcp.f32 %v928_v11  ;;  %1020 = vmatpush1.bf16.xpose.msra.mxu1 %v999_v61 }
 0x389   : > { %v1441_v32 = vpop.eup %1440 }
 0x38a   : > { %v931_v34 = vpop.xlane.xlu1 %930  ;;  %v978_v28 = vmul.f32 %v1441_v32, %v2195_v52  ;;  %v977_v21 = vmul.f32 %v1441_v32, %v2193_v35 }
 0x38b   : > { %1446 = vrcp.f32 %v931_v34 }
 0x38c   : > { %v1002_v55 = vpack.c.bf16 %v978_v28, %v976_v36  ;;  %v1001_v23 = vpack.c.bf16 %v977_v21, %v975_v53  ;;  %v1458_v53 = vld [vmem:[%s1939_s0] sm:$0xff] }
 0x38d   : > { %v1443_v42 = vpop.eup %1442 }
 0x38e   : > { %1021 = vmatprep.subr.bf16.mxu1 %v1002_v55  ;;  %v934_v14 = vpop.xlane.xlu0 %933  ;;  %v980_v63 = vmul.f32 %v1443_v42, %v2203_v6  ;;  %v979_v59 = vmul.f32 %v1443_v42, %v2201_v41  ;;  %v1459_v55 = vld [vmem:[%s1939_s0 + $0x8] sm:$0xff] }
 0x38f   : > { %1448 = vrcp.f32 %v934_v14  ;;  %1022 = vmatpush1.bf16.xpose.msra.mxu1 %v1001_v23 }
 0x391   : > { %v1445_v57 = vpop.eup %1444 }
 0x392   : > { %v982_v1 = vmul.f32 %v1445_v57, %v2211_v15  ;;  %v981_v52 = vmul.f32 %v1445_v57, %v2207_v43  ;;  %v669_v43 = vpop.permute.xlu1 %668 }
 0x393   : > { %v737_v9 = vadd.f32 %v2240_v38, %v669_v43  ;;  %v739_v44 = vadd.f32 %v2244_v29, %v669_v43 }
 0x394   : > { %v1004_v31 = vpack.c.bf16 %v982_v1, %v980_v63  ;;  %v1003_v47 = vpack.c.bf16 %v981_v52, %v979_v59  ;;  %v940_v39 = vpop.xlane.xlu0 %939  ;;  %v1460_v1 = vld [vmem:[%s1939_s0 + $0x10] sm:$0xff] }
 0x395   : > { %v1447_v35 = vpop.eup %1446  ;;  %1450 = vrcp.f32 %v940_v39 }
 0x396   : > { %1023 = vmatprep.subr.bf16.mxu1 %v1004_v31  ;;  %v984_v3 = vmul.f32 %v1447_v35, %v2217_v24  ;;  %v983_v60 = vmul.f32 %v1447_v35, %v2215_v22 }
 0x397   : > { %1024 = vmatpush1.bf16.xpose.msra.mxu1 %v1003_v47  ;;  %v1461_v47 = vld [vmem:[%s1939_s0 + $0x18] sm:$0xff] }
 0x399   : > { %v1449_v33 = vpop.eup %1448 }
 0x39a   : > { %v986_v5 = vmul.f32 %v1449_v33, %v2225_v30  ;;  %v985_v6 = vmul.f32 %v1449_v33, %v2221_v26 }
 0x39c   : > { %v1006_v15 = vpack.c.bf16 %v986_v5, %v984_v3  ;;  %v1005_v46 = vpack.c.bf16 %v985_v6, %v983_v60  ;;  %v946_v41 = vpop.xlane.xlu0 %945 }
 0x39e   : > { %1025 = vmatprep.subr.bf16.mxu1 %v1006_v15 }
 0x39f   : > { %1026 = vmatpush1.bf16.xpose.msra.mxu1 %v1005_v46  ;;  %v1451_v17 = vpop.eup %1450 }
 0x3a0   : > { %v990_v29 = vmul.f32 %v1451_v17, %v2231_v37 }
 0x3a4   : > { %v674_v56 = vpop.permute.xlu0 %673 }
 0x3a5   : > { %v741_v24 = vadd.f32 %v2252_v62, %v674_v56  ;;  %v743_v30 = vadd.f32 %v2254_v0, %v674_v56  ;;  %v989_v0 = vmul.f32 %v1451_v17, %v2229_v25 }
 0x3a7   : > { %v1011_v48 = vpack.c.bf16 %v741_v24, %v737_v9  ;;  %v1012_v22 = vpack.c.bf16 %v743_v30, %v739_v44 }
 0x3a9   : > { %1047 = vmatprep.mubr.bf16.mxu1 %v1012_v22 }
 0x3bf   : > { %v937_v26 = vpop.xlane.xlu1 %936 }
 0x3c0   : > { %1452 = vrcp.f32 %v937_v26 }
 0x3c1   : > { %1454 = vrcp.f32 %v946_v41 }
 0x3c3   : > { %v943_v49 = vpop.xlane.xlu1 %942 }
 0x3c4   : > { %1456 = vrcp.f32 %v943_v49 }
 0x3c7   : > { %v679_v2 = vpop.permute.xlu1 %678 }
 0x3c8   : > { %v747_v18 = vadd.f32 %v2274_v13, %v679_v2  ;;  %v749_v16 = vadd.f32 %v2276_v50, %v679_v2 }
 0x3ca   : > { %v1453_v45 = vpop.eup %1452 }
 0x3cb   : > { %v684_v20 = vpop.permute.xlu1 %683  ;;  %v988_v38 = vmul.f32 %v1453_v45, %v2261_v4  ;;  %v987_v62 = vmul.f32 %v1453_v45, %v2259_v54  ;;  %v1455_v8 = vpop.eup %1454 }
 0x3cc   : > { %v751_v58 = vadd.f32 %v2281_v51, %v684_v20  ;;  %v753_v61 = vadd.f32 %v2283_v19, %v684_v20  ;;  %v994_v54 = vmul.f32 %v1455_v8, %v2242_v40  ;;  %v993_v50 = vmul.f32 %v1455_v8, %v2235_v10 }
 0x3cd   : > { %v1008_v11 = vpack.c.bf16 %v990_v29, %v988_v38  ;;  %v1007_v27 = vpack.c.bf16 %v989_v0, %v987_v62 }
 0x3ce   : > { %v1457_v32 = vpop.eup %1456  ;;  %v1013_v34 = vpack.c.bf16 %v751_v58, %v747_v18  ;;  %v1014_v4 = vpack.c.bf16 %v753_v61, %v749_v16 }
 0x3cf   : > { %1027 = vmatprep.subr.bf16.mxu1 %v1008_v11  ;;  %v992_v37 = vmul.f32 %v1457_v32, %v2267_v12  ;;  %v991_v13 = vmul.f32 %v1457_v32, %v2263_v7  ;;  %v1065_v12 = vstv %s1064_s9  ;;  %s1657_s9 = smov [#allocation8]  }
 0x3d0   : > { %1028 = vmatpush1.bf16.xpose.msra.mxu1 %v1007_v27  ;;  %s1526_s15 = sshll.u32 %s1657_s9, 4  ;;  %s1527_s15 = int_to_ptr.vmem [resolvable:$false] %s1526_s15 }
 0x3d1   : > { %v1010_v25 = vpack.c.bf16 %v994_v54, %v992_v37  ;;  %v1009_v51 = vpack.c.bf16 %v993_v50, %v991_v13  ;;  %s1528_s26 = scalar_lea.vmem %s1527_s15, 1024  ;;  %p1529_p4 = scmp.lt.s32.totalorder %s2331_s23, %s1527_s15 }
 0x3d2   : > { %p1530_p3 = scmp.lt.s32.totalorder %s1528_s26, %s1522_s16 }
 0x3d3   : > { %1029 = vmatprep.subr.bf16.mxu1 %v1010_v25 }
 0x3d4   : > { %p1531_p2 = por %p1530_p3, %p1529_p4 }
 0x3d6   : > { %p1532_p9 = pnand %p1531_p2, %p1525_p12 }
 0x3d8   : > { %1030 = vmatpush1.bf16.xpose.msra.mxu1 %v1009_v51 }
 0x3df   : > { %1048 = vmatmul.mubr.bf16.vlgmr.msra.gmra.mrb[32].mxu1 %v1011_v48 }
 0x3e0   : > { %1055 = vmatprep.mubr.bf16.mxu1 %v1014_v4 }
 0x3e7   : > { %1056 = vmatmul.mubr.bf16.gmra.mrb[36].mxu1 %v1013_v34 }
 0x4b2   : > { %v1049_v40 = vpop.f32.mrb[32].mxu1 }
 0x4b3   : > { %v1066_v19 = vmul.f32 %v1065_v12, %v1049_v40  ;;  %v1051_v36 = vpop.f32.mrb[33].mxu1 }
 0x4b4   : > { %v1052_v28 = vpop.f32.mrb[34].mxu1 }
 0x4b5   : > { %v1070_v7 = vadd.f32 %v1458_v53, %v1066_v19  ;;  %v1067_v21 = vmul.f32 %v1065_v12, %v1052_v28  ;;  %v1054_v10 = vpop.f32.mrb[35].mxu1 }
 0x4b7   : > { %1074 = vst [vmem:[%s354_s25] sm:$0xff] %v1070_v7  ;;  %v1071_v23 = vadd.f32 %v1459_v55, %v1067_v21 }
 0x4b9   : > { %1075 = vst [vmem:[%s354_s25 + $0x8] sm:$0xff] %v1071_v23 }
 0x4ba   : > { %v1057_v14 = vpop.f32.mrb[36].mxu1 }
 0x4bb   : > { %v1068_v42 = vmul.f32 %v1065_v12, %v1057_v14  ;;  %v1059_v57 = vpop.f32.mrb[37].mxu1 }
 0x4bc   : > { %v1060_v63 = vpop.f32.mrb[38].mxu1 }
 0x4bd   : > { %v1072_v59 = vadd.f32 %v1460_v1, %v1068_v42  ;;  %v1069_v52 = vmul.f32 %v1065_v12, %v1060_v63  ;;  %v1062_v31 = vpop.f32.mrb[39].mxu1 }
 0x4bf   : > { %1076 = vst [vmem:[%s354_s25 + $0x10] sm:$0xff] %v1072_v59  ;;  %v1073_v35 = vadd.f32 %v1461_v47, %v1069_v52 }
 0x4c1   : > { %1077 = vst [vmem:[%s354_s25 + $0x18] sm:$0xff] %v1073_v35 }
 0x4c2   : > { %1535 = shalt.err (!%p1532_p9)
}
 0x4c3   : > { %s1536_s0 = scalar_lea.hbm %s2337_s22, 512  ;;  %s1540_s7 = scalar_lea.hbm %s2448_s13, 2048 }
 0x4c4   : > { %p1537_p0 = scmp.ne.s32.totalorder %s2337_s22, %s1536_s0  ;;  %p1541_p6 = scmp.lt.u32.totalorder %s2337_s22, %s2448_s13 }
 0x4c5   : > { %p1542_p8 = scmp.lt.u32.totalorder %s1540_s7, %s1536_s0  ;;  %p1544_p7 = scmp.lt.u32.totalorder %s1536_s0, %s2337_s22 }
 0x4c6   : > { %p1538_p1 = pnand %p1537_p0, %p2449_p11 }
 0x4c7   : > { %p1543_p10 = por %p1542_p8, %p1541_p6 }
 0x4c8   : > { %p1539_p13 = pneg %p1538_p1 }
 0x4c9   : > { %p1545_p5 = por %p1544_p7, %p1543_p10 }
 0x4cb   : > { %p1546_p12 = pnand %p1545_p5, %p1539_p13 }
 0x4cd   : > { %1549 = shalt.err (!%p1546_p12)
}
 0x4ce   : > { %s1658_s16 = smov 128   ;;  %s1659_s15 = smov 256  }
 0x4cf   : > { %s1660_s26 = smov 8  }
 0x4d0   : > { %1245 = dma.vmem_to_hbm [thread:$0]  (%p2449_p11), %s2331_s23, 512, %s2337_s22, %s1079_s19, %s1658_s16, %s1659_s15, %s1660_s26  }
 0x4d1 PF: > { %s2450_s25 = sld [smem:[#allocation17_spill]]  ;;  %p1259_p4 = scmp.ge.s32.totalorder %s1648_s12, 2 }
 0x4d2   : > { %s1108_s18 = sand.u32 1, %s1620_s29  }
 0x4d3   : > { %s1109_s0 = scalar_lea.sflag [#allocation5], %s1108_s18 }
 0x4d7   : > { %p2451_p3 = scmp.ne.s32.totalorder %s2450_s25, 0 }
 0x4d9   : > { %p1255_p2 = pnand %p1259_p4, %p2451_p3 }
 0x4db   : > { %1603 = dma.done.wait (!%p1255_p2), %s1109_s0, 512  }
 0x4dc   : > { %1605 = vsyncadd (!%p1255_p2), %s1109_s0, 4294966784  ;;  %s27_s12 = sadd.s32 1, %s1648_s12   ;;  %s2452_s24 = sld [smem:[#allocation14_spill]] }
 0x4dd   : > { %p24_p9 = scmp.ge.s32.totalorder %s27_s12, 6   ;;  %s2453_s23 = sld [smem:[#allocation15_spill]] }
 0x4de   : > { %s2454_s26 = smov %s1612_s27  ;;  %s2455_s27 = smov %s1616_s28 }
 0x4df   : > { %s2456_s28 = smov %s1866_s20  ;;  %s2457_s29 = smov %s1624_s30 }
 0x4e0   : > { %s2458_s30 = smov %s1628_s8  ;;  %s2459_s8 = smov %s1805_s14 }
 0x4e1   : > { %s2460_s9 = smov %s1640_s10  ;;  %s2461_s0 = smov %s1644_s11 }
 0x4e2   : > { %s2462_s10 = smov %s2452_s24  ;;  %26 = sbr.rel (!%p24_p9) target bundleno = 14 (0xe), region = 106 }
 0x4e3   : > { %s2463_s11 = smov %s2453_s23 }
 0x4e9   :  { %1114 = vsyncpa [#allocation4], 1 }
 0x4ea   :  { %1116 = vsyncpa [#allocation4 + $0x1], 1 }
 0x4eb   :  { %1117 = vsyncpa [#allocation7], 1 }
 0x4ec   :  { %1119 = vsyncpa [#allocation7 + $0x1], 1 }
 0x4ed   :  { %1120 = vsyncpa [#allocation5], 1 }
 0x4ee   :  { %1122 = vsyncpa [#allocation5 + $0x1], 1 }

</bundles_post_ra>
